<compile_context>
chip_gen: v6e
topology: v6e:2x2x1
jax: 0.10.0
libtpu: 0.0.40
codegen_flags: <defaults>
</compile_context>

<pallas_src>
import math

import jax
import jax.numpy as jnp
from jax.experimental import pallas as pl
from jax.experimental.pallas import tpu as pltpu


# ---------------------------------------------------------------------------
# Buffer construction (mirrors SinCosPositionalEmbedding2d.__init__ exactly).
# ---------------------------------------------------------------------------
def build_sincos_pe_2d(d_model, seq_len, cls_token=False, dtype=jnp.float32):
    height = width = int(math.sqrt(seq_len))
    assert height * width == seq_len, "seq_len should be a square number"
    if d_model % 4 != 0:
        raise ValueError(
            "Cannot use sin/cos positional encoding with odd dimension "
            f"(got dim={d_model})"
        )
    d_half = d_model // 2
    div_term = jnp.exp(
        jnp.arange(0.0, d_half, 2.0) * -(math.log(10000.0) / d_half)
    )  # (d_half // 2,)
    n = div_term.shape[0]
    pos_w = jnp.arange(0.0, width)[:, None]   # (W, 1)
    pos_h = jnp.arange(0.0, height)[:, None]  # (H, 1)
    sin_w = jnp.sin(pos_w * div_term)  # (W, n)
    cos_w = jnp.cos(pos_w * div_term)  # (W, n)
    sin_h = jnp.sin(pos_h * div_term)  # (H, n)
    cos_h = jnp.cos(pos_h * div_term)  # (H, n)

    pe = jnp.zeros((height, width, d_model), dtype=jnp.float32)
    pe = pe.at[:, :, 0:d_half:2].set(jnp.broadcast_to(sin_w[None], (height, width, n)))
    pe = pe.at[:, :, 1:d_half:2].set(jnp.broadcast_to(cos_w[None], (height, width, n)))
    pe = pe.at[:, :, d_half::2].set(jnp.broadcast_to(sin_h[:, None], (height, width, n)))
    pe = pe.at[:, :, d_half + 1::2].set(
        jnp.broadcast_to(cos_h[:, None], (height, width, n))
    )
    pe = pe.reshape(-1, d_model)  # (seq_len, d_model)
    if cls_token:
        pe = jnp.concatenate([jnp.zeros((1, d_model), pe.dtype), pe], axis=0)
    # Store the buffer in the model compute dtype at init (no per-call cast).
    return pe.astype(dtype)


# ---------------------------------------------------------------------------
# Pallas kernel: out[b, s_block] = x[b, s_block] + pe[s_block]
# ---------------------------------------------------------------------------
def _add_pe_kernel(x_ref, pe_ref, o_ref):
    # All refs are 2-D (tile_s, D): batch dim is squeezed by the BlockSpec.
    o_ref[...] = x_ref[...] + pe_ref[...]


def _select_tile_s(S, D, itemsize, B, vmem_budget_bytes):
    """Largest divisor of S that is a multiple of the dtype sublane tile and
    fits the VMEM budget.  Falls back to the always-legal full-S block."""
    sublane = max(8, 32 // itemsize)  # f32: 8, bf16: 16, int8/fp8: 32
    # Live VMEM ~= double-buffered (x_tile + pe_tile + out_tile).
    max_rows = max(sublane, vmem_budget_bytes // (6 * D * itemsize))
    max_rows = min(max_rows, 1024)  # roofline knee: no measurable gain beyond
    cands = [
        t for t in range(sublane, min(S, max_rows) + 1, sublane) if S % t == 0
    ]
    if B == 1:
        # Prefer >= 2 sequence blocks so both v7x TensorCores get work.
        split = [t for t in cands if t < S]
        if split:
            return max(split)
    if cands:
        return max(cands)
    # Full-extent block along S is always legal (no (8,128) divisibility
    # requirement when the block spans the whole dim).
    # TODO(synk): if S has no sublane-multiple divisor AND full-S exceeds the
    # VMEM budget (huge S*D), an in-kernel masked tail would be needed.
    return S


def sincos_positional_embedding_2d(x, pe, *, vmem_budget_bytes=12 << 20):
    """x: (B, S, D); pe: (>=S, D) in x.dtype.  Returns x + pe[:S] over batch."""
    B, S, D = x.shape
    assert pe.shape[0] >= S and pe.shape[1] == D
    pe_s = pe if pe.shape[0] == S else pe[:S]
    if pe_s.dtype != x.dtype:
        # Small (S, D) table only; callers should build pe in the compute dtype.
        pe_s = pe_s.astype(x.dtype)

    itemsize = jnp.dtype(x.dtype).itemsize
    tile_s = _select_tile_s(S, D, itemsize, B, vmem_budget_bytes)
    num_s_blocks = S // tile_s if S % tile_s == 0 else 1  # fallback => full S
    if num_s_blocks == 1:
        tile_s = S

    footprint = 6 * tile_s * D * itemsize
    vmem_limit = int(min(max(32 << 20, footprint * 3 // 2), 60 << 20))

    cost = pl.CostEstimate(
        flops=B * S * D,
        transcendentals=0,
        bytes_accessed=(2 * B * S * D + S * D) * itemsize,
    )

    out = pl.pallas_call(
        _add_pe_kernel,
        out_shape=jax.ShapeDtypeStruct((B, S, D), x.dtype),
        grid_spec=pltpu.PrefetchScalarGridSpec(
            num_scalar_prefetch=0,
            # Batch is the innermost axis: pe's block index is constant over it,
            # so the pe tile is DMA'd once per sequence block and reused.
            grid=(num_s_blocks, B),
            in_specs=[
                pl.BlockSpec((None, tile_s, D), lambda i, b: (b, i, 0)),
                pl.BlockSpec((tile_s, D), lambda i, b: (i, 0)),
            ],
            out_specs=pl.BlockSpec((None, tile_s, D), lambda i, b: (b, i, 0)),
        ),
        compiler_params=pltpu.CompilerParams(
            dimension_semantics=("parallel", "parallel"),
            vmem_limit_bytes=vmem_limit,
        ),
        cost_estimate=cost,
        # Output has the same shape/dtype as x: alias so a donating caller
        # avoids a second full-size HBM buffer.
        input_output_aliases={0: 0},
    )(x, pe_s)

    return out


if __name__ == "__main__":
    # Small shapes consistent with the module: seq_len must be a perfect
    # square, d_model divisible by 4.
    B = 2
    seq_len = 16      # height = width = 4
    d_model = 128     # lane-dense last dim

    key = jax.random.PRNGKey(0)
    x = jax.random.normal(key, (B, seq_len, d_model), dtype=jnp.float32)

    # pe construction mirrors the torch __init__ (register_buffer); it is
    # init-time JAX code, not part of the Pallas forward kernel.
    pe = build_sincos_pe_2d(d_model, seq_len, cls_token=False, dtype=x.dtype)

    out = sincos_positional_embedding_2d(x, pe)
    out = jax.block_until_ready(out)

    # Reference (plain JAX, same semantics as the torch forward).
    ref = x + pe[:seq_len][None]
    assert out.shape == (B, seq_len, d_model)
    assert jnp.allclose(out, ref, atol=1e-6, rtol=1e-6)

    print("KERNEL_OK")
</pallas_src>

<mosaic_0001>
module attributes {stable_mosaic.version = 11 : i64} {
  func.func @_add_pe_kernel(%arg0: i32, %arg1: i32, %arg2: memref<1x16x128xf32, #tpu.memory_space<vmem>>, %arg3: memref<16x128xf32, #tpu.memory_space<vmem>>, %arg4: memref<1x16x128xf32, #tpu.memory_space<vmem>>) attributes {dimension_semantics = [#tpu.dimension_semantics<parallel>, #tpu.dimension_semantics<parallel>], iteration_bounds = array<i64: 1, 2>, scalar_prefetch = 0 : i64, scratch_operands = 0 : i64, tpu.core_type = #tpu.core_type<tc>, window_params = [{transform_indices = @transform_0, window_bounds = array<i64: 1, 16, 128>}, {transform_indices = @transform_1, window_bounds = array<i64: 16, 128>}, {transform_indices = @transform_2, window_bounds = array<i64: 1, 16, 128>}]} {
    %c0 = arith.constant 0 : index
    %c0_0 = arith.constant 0 : index
    %c0_1 = arith.constant 0 : index
    %0 = vector.load %arg2[%c0, %c0_0, %c0_1] : memref<1x16x128xf32, #tpu.memory_space<vmem>>, vector<1x16x128xf32>
    %1 = vector.shape_cast %0 : vector<1x16x128xf32> to vector<16x128xf32>
    %c0_2 = arith.constant 0 : index
    %c0_3 = arith.constant 0 : index
    %2 = vector.load %arg3[%c0_2, %c0_3] : memref<16x128xf32, #tpu.memory_space<vmem>>, vector<16x128xf32>
    %3 = arith.addf %1, %2 : vector<16x128xf32>
    %c0_4 = arith.constant 0 : index
    %c0_5 = arith.constant 0 : index
    %c0_6 = arith.constant 0 : index
    %4 = vector.load %arg4[%c0_4, %c0_5, %c0_6] : memref<1x16x128xf32, #tpu.memory_space<vmem>>, vector<1x16x128xf32>
    %5 = vector.shape_cast %4 : vector<1x16x128xf32> to vector<16x128xf32>
    %6 = vector.shape_cast %3 : vector<16x128xf32> to vector<1x16x128xf32>
    tpu.vector_store %arg4[%c0_4, %c0_5, %c0_6], %6 {strides = array<i32>} : memref<1x16x128xf32, #tpu.memory_space<vmem>>, vector<1x16x128xf32>,
    return
  }
  func.func @transform_0(%arg0: i32, %arg1: i32) -> (i32, i32, i32) {
    %c0_i32 = arith.constant 0 : i32
    %c0_i32_0 = arith.constant 0 : i32
    return %arg1, %arg0, %c0_i32 : i32, i32, i32
  }
  func.func @transform_1(%arg0: i32, %arg1: i32) -> (i32, i32) {
    %c0_i32 = arith.constant 0 : i32
    %c0_i32_0 = arith.constant 0 : i32
    return %arg0, %c0_i32 : i32, i32
  }
  func.func @transform_2(%arg0: i32, %arg1: i32) -> (i32, i32, i32) {
    %c0_i32 = arith.constant 0 : i32
    %c0_i32_0 = arith.constant 0 : i32
    return %arg1, %arg0, %c0_i32 : i32, i32, i32
  }
}

</mosaic_0001>

<bundles_post_ra>
// kernel: tpu_custom_call.1
= control target key start
LH: loop header
LB: loop body
LE: loop exit
PB: predicated region body
PF: predicated region fallthrough
CT: control target
= control target key end

     0   :  { %7 = vsyncpa [#allocation3], 0  ;;  %s697_s0 = inlined_call_operand.hbm [shape: f32[2,16,128], index: 0, kind: input, shape index: {}, may-alias: {0,2}]   ;;  %s698_s1 = inlined_call_operand.vmem [shape: f32[16,128], index: 1, kind: input, shape index: {}]   ;;  %s699_s2 = inlined_call_operand.hbm [shape: f32[2,16,128], index: 2, kind: output, shape index: {}, may-alias: {0,2}]  }
   0x1   :  { %9 = vsyncpa [#allocation3 + $0x1], 0 }
   0x2   :  { %10 = vsyncpa [#allocation4], 0 }
   0x3   :  { %12 = vsyncpa [#allocation4 + $0x1], 0  ;;  %s545_s9 = smov 0   ;;  %s547_s10 = smov 0  }
   0x4   :  { %s549_s11 = smov 0   ;;  %s551_s12 = smov 0  }
   0x5   :  { %s553_s13 = smov 0   ;;  %s555_s14 = smov 0  }
   0x6 LB: > { %s330_s15 = sadd.s32 4294967295, %s522_s14   ;;  %s331_s16 = sadd.s32 4294967294, %s522_s14   ;;  %s522_s14 = sphi %s555_s14, %s18_s14   ;;  %s518_s13 = sphi %s553_s13, %s710_s13   ;;  %s514_s12 = sphi %s551_s12, %s709_s12   ;;  %s510_s11 = sphi %s549_s11, %s708_s11   ;;  %s506_s10 = sphi %s547_s10, %s707_s10   ;;  %s502_s9 = sphi %s545_s9, %s706_s9  }
   0x7   : > { %s27_s17 = sadd.s32 1, %s518_s13  ;;  %s39_s18 = sadd.s32 1, %s510_s11 }
   0x8   : > { %p28_p0 = scmp.ge.s32.totalorder %s27_s17, 2  ;;  %p46_p1 = scmp.ne.s32.totalorder %s510_s11, %s506_s10 }
   0x9   : > { %p47_p2 = scmp.eq.s32.totalorder %s522_s14, 0  ;;  %p52_p3 = scmp.ne.s32.totalorder %s506_s10, %s502_s9 }
   0xa   : > { %s712_s17 = smov (%p28_p0, %s27_s17), 0  ;;  %p53_p5 = scmp.eq.s32.totalorder %s330_s15, 0 }
   0xb   : > { %p586_p4 = por %p47_p2, %p46_p1  ;;  %s34_s20 = ssub.s32 %s518_s13, %s712_s17 }
   0xc   : > { %p104_p6 = scmp.eq.s32.totalorder %s330_s15, 1  ;;  %p37_p7 = scmp.eq.s32.totalorder %s34_s20, 0 }
   0xd   : > { %p592_p8 = por %p53_p5, %p52_p3  ;;  %p110_p10 = scmp.eq.s32.totalorder %s331_s16, 1 }
   0xe   : > { %p596_p9 = por %p104_p6, %p46_p1  ;;  %p360_p13 = scmp.lt.s32.totalorder %s522_s14, 2 }
   0xf   : > { %s601_s23 = scalar_select %p37_p7, %s510_s11, %s39_s18  }
  0x10   : > { %p603_p11 = por %p110_p10, %p52_p3  ;;  %s139_s25 = sand.u32 1, %s510_s11  }
  0x11   : > { %s335_s26 = sshll.u32 %s139_s25, 4  ;;  %s346_s27 = sshll.u32 %s518_s13, 8 }
  0x12   : > { %s151_s30 = scalar_lea.hbm %s697_s0, %s346_s27  ;;  %s143_s3 = scalar_lea.vmem [#allocation2], %s335_s26 }
  0x13   : > { %s152_s4 = sshll.u32 %s143_s3, 4  ;;  %p616_p0 = pnand %p360_p13, %p586_p4  ;;  %s153_s4 = int_to_ptr.vmem [resolvable:$true] %s152_s4 }
  0x14   : > { %p338_p1 = scmp.ge.s32.totalorder %s522_s14, 1  ;;  %s140_s6 = scalar_lea.sflag [#allocation3], %s139_s25 }
  0x15   : > { %p416_p2 = pneg %p616_p0  ;;  %s427_s7 = scalar_lea.vmem %s153_s4, 256 }
  0x16   : > { %p428_p3 = scmp.ne.s32.totalorder %s153_s4, %s427_s7  ;;  %s524_s8 = smov [#allocation2]  }
  0x17   : > { %s432_s15 = sshll.u32 %s524_s8, 4  ;;  %s433_s15 = int_to_ptr.vmem [resolvable:$false] %s432_s15 }
  0x18   : > { %p430_p5 = pnand %p428_p3, %p416_p2  ;;  %s434_s16 = scalar_lea.vmem %s433_s15, 512 }
  0x19   : > { %p435_p7 = scmp.lt.s32.totalorder %s153_s4, %s433_s15  ;;  %p436_p10 = scmp.lt.s32.totalorder %s434_s16, %s427_s7 }
  0x1a   : > { %p431_p6 = pneg %p430_p5 }
  0x1b   : > { %p437_p12 = por %p436_p10, %p435_p7 }
  0x1d   : > { %p438_p4 = pnand %p437_p12, %p431_p6 }
  0x1f   : > { %441 = shalt.err (!%p438_p4)
}
  0x20   : > { %s525_s18 = smov 128   ;;  %s526_s19 = smov 8  }
  0x21   : > { %355 = dma.hbm_to_vmem [thread:$0]  (!%p616_p0), %s151_s30, 256, %s153_s4, %s140_s6, %s525_s18, %s525_s18, %s526_s19  }
  0x22   : > { %p160_p13 = scmp.lt.s32.totalorder %s522_s14, 3 }
  0x24   : > { %p161_p2 = pnand %p338_p1, %p160_p13 }
  0x25   : > { %s629_s20 = sand.u32 (!%p161_p2), 1, %s506_s10  }
  0x26   : > { %164 = sbr.rel (%p161_p2) target bundleno = 69 (0x45), region = 28  ;;  %s339_s25 = sshll.u32 (!%p161_p2), %s629_s20, 4 }
  0x27   : > { %s167_s26 = scalar_lea.sflag (!%p161_p2), [#allocation3], %s629_s20  ;;  %s170_s27 = scalar_lea.vmem (!%p161_p2), [#allocation2], %s339_s25 }
  0x2b   : > { %493 = dma.done.wait (%p592_p8), %s167_s26, 256  }
  0x2c   : > { %495 = vsyncadd (%p592_p8), %s167_s26, 4294967040  ;;  %s195_s28 = scalar_lea.vmem [#allocation5], %s339_s25  ;;  %s347_s30 = sshll.u32 %s514_s12, 8  ;;  %v204_v0 = vld [vmem:[%s170_s27] sm:$0xff]  ;;  %v205_v2 = vld [vmem:[%s170_s27 + $0x8] sm:$0xff] }
  0x2d   : > { %s228_s29 = sshll.u32 %s195_s28, 4  ;;  %v206_v1 = vld [vmem:[%s698_s1] sm:$0xff]  ;;  %v207_v4 = vld [vmem:[%s698_s1 + $0x8] sm:$0xff]  ;;  %s649_s12 = scalar_lea.hbm %s699_s2, %s347_s30  ;;  %s641_s29 = int_to_ptr.vmem [resolvable:$true] %s228_s29 }
  0x2e   : > { %v208_v3 = vadd.f32 %v206_v1, %v204_v0  ;;  %v209_v5 = vadd.f32 %v207_v4, %v205_v2  ;;  %s213_s8 = scalar_lea.sflag [#allocation4], %s629_s20  ;;  %s442_s15 = scalar_lea.vmem %s641_s29, 256 }
  0x2f   : > { %p443_p8 = scmp.ne.s32.totalorder %s641_s29, %s442_s15  ;;  %s527_s16 = smov [#allocation5]  }
  0x30   : > { %210 = vst [vmem:[%s195_s28] sm:$0xff] %v208_v3  ;;  %211 = vst [vmem:[%s195_s28 + $0x8] sm:$0xff] %v209_v5  ;;  %s446_s18 = sshll.u32 %s527_s16, 4  ;;  %s447_s18 = int_to_ptr.vmem [resolvable:$false] %s446_s18 }
  0x31   : > { %p444_p12 = pnand %p443_p8, %p596_p9  ;;  %s448_s19 = scalar_lea.vmem %s447_s18, 512 }
  0x32   : > { %p449_p1 = scmp.lt.s32.totalorder %s641_s29, %s447_s18  ;;  %p450_p3 = scmp.lt.s32.totalorder %s448_s19, %s442_s15 }
  0x33   : > { %p445_p0 = pneg %p444_p12 }
  0x34   : > { %p451_p5 = por %p450_p3, %p449_p1 }
  0x36   : > { %p452_p6 = pnand %p451_p5, %p445_p0 }
  0x38   : > { %455 = shalt.err (!%p452_p6)
}
  0x39   : > { %s456_s25 = scalar_lea.hbm %s649_s12, 256  ;;  %s460_s28 = scalar_lea.hbm %s699_s2, 512 }
  0x3a   : > { %p457_p7 = scmp.ne.s32.totalorder %s649_s12, %s456_s25  ;;  %p461_p13 = scmp.lt.s32.totalorder %s649_s12, %s699_s2 }
  0x3b   : > { %p462_p2 = scmp.lt.s32.totalorder %s460_s28, %s456_s25 }
  0x3c   : > { %p458_p10 = pnand %p457_p7, %p596_p9 }
  0x3d   : > { %p463_p8 = por %p462_p2, %p461_p13 }
  0x3e   : > { %p459_p4 = pneg %p458_p10 }
  0x40   : > { %p464_p12 = pnand %p463_p8, %p459_p4 }
  0x42   : > { %467 = shalt.err (!%p464_p12)
}
  0x43   : > { %s528_s4 = smov 128   ;;  %s529_s5 = smov 8  }
  0x44   : > { %350 = dma.vmem_to_hbm [thread:$0]  (%p596_p9), %s641_s29, 256, %s649_s12, %s213_s8, %s528_s4, %s528_s4, %s529_s5  }
  0x45 PF: > { %s243_s6 = sand.u32 1, %s502_s9   ;;  %p705_p0 = scmp.ge.s32.totalorder %s522_s14, 2 }
  0x46   : > { %s244_s21 = scalar_lea.sflag [#allocation4], %s243_s6 }
  0x47   : > { %p357_p1 = pnand %p705_p0, %p603_p11 }
  0x49   : > { %p358_p3 = pneg %p357_p1 }
  0x4b   : > { %497 = dma.done.wait (%p358_p3), %s244_s21, 256  }
  0x4c   : > { %499 = vsyncadd (%p358_p3), %s244_s21, 4294967040  ;;  %s18_s14 = sadd.s32 1, %s522_s14   ;;  %s706_s9 = smov %s506_s10 }
  0x4d   : > { %p15_p5 = scmp.ge.s32.totalorder %s18_s14, 4   ;;  %s707_s10 = smov %s510_s11 }
  0x4e   : > { %s708_s11 = smov %s601_s23  ;;  %s709_s12 = smov %s518_s13 }
  0x4f   : > { %s710_s13 = smov %s712_s17  ;;  %17 = sbr.rel (!%p15_p5) target bundleno = 6 (0x6), region = 76 }
  0x54   :  { %249 = vsyncpa [#allocation3], 1 }
  0x55   :  { %251 = vsyncpa [#allocation3 + $0x1], 1 }
  0x56   :  { %252 = vsyncpa [#allocation4], 1 }
  0x57   :  { %254 = vsyncpa [#allocation4 + $0x1], 1 }

</bundles_post_ra>
